<compile_context>
chip_gen: v5e
topology: v5e:2x2
jax: 0.10.0
libtpu: 0.0.40
codegen_flags: <defaults>
</compile_context>

<pallas_src>
import jax
import jax.numpy as jnp
from jax.experimental import pallas as pl
from jax.experimental.pallas import tpu as pltpu

_EPS = 1e-5
_VMEM_TILE_BUDGET = 10 * 1024 * 1024   # target working-set per call (fits all gens)
_VMEM_LIMIT = 32 * 1024 * 1024         # explicit scoped-VMEM limit (safe v5e..v7x)
_LANE_CAP = 8192                       # max spatial lanes per tile


# ---------------------------------------------------------------------------
# Tile selection: biggest lane-dense tile that fits the VMEM budget; prefer an
# exact divisor of HW (no edge tile), otherwise cdiv grid with a masked edge.
# ---------------------------------------------------------------------------
def _pick_spatial_tile(hw, per_lane_bytes, budget=_VMEM_TILE_BUDGET, cap=_LANE_CAP):
    per_lane_bytes = max(int(per_lane_bytes), 1)
    fit = max(128, budget // per_lane_bytes)
    if hw <= cap and hw <= fit:
        return hw                              # full extent: always a legal block
    tmax = max(128, (min(cap, fit) // 128) * 128)
    if hw % 128 == 0:
        t = tmax
        while t > 128 and hw % t != 0:
            t -= 128
        if hw % t == 0:
            return t
    return tmax                                # cdiv grid; pass-1 masks the edge tile


# ---------------------------------------------------------------------------
# Pass 1: per-conv-channel (2C) sum / sum-of-squares of W @ x (bias excluded),
# accumulated across spatial tiles into resident f32 outputs.
# ---------------------------------------------------------------------------
def _make_stats_kernel(hw, tile):
    need_mask = (hw % tile) != 0

    def kernel(x_ref, w_ref, sum_ref, sq_ref):
        s = pl.program_id(1)

        @pl.when(s == 0)
        def _():
            sum_ref[...] = jnp.zeros_like(sum_ref)
            sq_ref[...] = jnp.zeros_like(sq_ref)

        # (2C, C) @ (C, T) on the MXU, f32 accumulation, no operand upcast.
        y = jnp.dot(w_ref[...], x_ref[0], preferred_element_type=jnp.float32)
        if need_mask:   # zero lanes past the end of the (partial) edge tile
            lane = jax.lax.broadcasted_iota(jnp.int32, y.shape, 1)
            y = jnp.where(lane < (hw - s * tile), y, 0.0)

        sum_ref[0] += jnp.sum(y, axis=1, keepdims=True)      # (2C, 1)
        sq_ref[0] += jnp.sum(y * y, axis=1, keepdims=True)   # (2C, 1)

    return kernel


def _run_pass1(x3, conv_w, tile):
    B, C, HW = x3.shape
    C2 = 2 * C
    n_s = pl.cdiv(HW, tile)
    return pl.pallas_call(
        _make_stats_kernel(HW, tile),
        out_shape=(jax.ShapeDtypeStruct((B, C2, 1), jnp.float32),
                   jax.ShapeDtypeStruct((B, C2, 1), jnp.float32)),
        grid_spec=pltpu.PrefetchScalarGridSpec(
            num_scalar_prefetch=0,
            grid=(B, n_s),
            in_specs=[
                pl.BlockSpec((1, C, tile), lambda b, s: (b, 0, s)),
                pl.BlockSpec((C2, C), lambda b, s: (0, 0)),
            ],
            out_specs=[
                pl.BlockSpec((1, C2, 1), lambda b, s: (b, 0, 0)),
                pl.BlockSpec((1, C2, 1), lambda b, s: (b, 0, 0)),
            ],
        ),
        compiler_params=pltpu.CompilerParams(
            dimension_semantics=("parallel", "arbitrary"),
            vmem_limit_bytes=_VMEM_LIMIT),
    )(x3, conv_w)


# ---------------------------------------------------------------------------
# Pass 2: v = (scale*W_b) @ x + shift, per-channel PReLU, optional fused r=2
# channel->width interleave so the store is already in (C, 2T) output layout.
# ---------------------------------------------------------------------------
def _make_norm_prelu_kernel(c, fuse_interleave):
    def kernel(x_ref, w_ref, shift_ref, alpha_ref, out_ref):
        x = x_ref[0]                                     # (C, T), input dtype
        w = w_ref[0]                                     # (2C, C), scale pre-folded
        v = jnp.dot(w, x, preferred_element_type=jnp.float32) + shift_ref[0]
        a = alpha_ref[...]                               # (2C, 1)
        v = jnp.where(v > 0, v, a * v)                   # per-channel PReLU
        if fuse_interleave:
            t = x.shape[1]
            # out[c, 2t + r] = v[r*C + c, t]  (sub-pixel shuffle, on-chip interleave)
            out = jnp.stack([v[:c, :], v[c:, :]], axis=-1).reshape(c, 2 * t)
            out_ref[0] = out.astype(out_ref.dtype)
        else:
            out_ref[0] = v.astype(out_ref.dtype)

    return kernel


def _run_pass2(x3, w_fold, shift2, alpha2, out_dtype, tile, fuse):
    B, C, HW = x3.shape
    C2 = 2 * C
    n_s = pl.cdiv(HW, tile)
    if fuse:
        out_shape = jax.ShapeDtypeStruct((B, C, 2 * HW), out_dtype)
        out_spec = pl.BlockSpec((1, C, 2 * tile), lambda b, s: (b, 0, s))
    else:
        out_shape = jax.ShapeDtypeStruct((B, C2, HW), out_dtype)
        out_spec = pl.BlockSpec((1, C2, tile), lambda b, s: (b, 0, s))
    return pl.pallas_call(
        _make_norm_prelu_kernel(C, fuse),
        out_shape=out_shape,
        grid_spec=pltpu.PrefetchScalarGridSpec(
            num_scalar_prefetch=0,
            grid=(B, n_s),
            in_specs=[
                pl.BlockSpec((1, C, tile), lambda b, s: (b, 0, s)),
                pl.BlockSpec((1, C2, C), lambda b, s: (b, 0, 0)),
                pl.BlockSpec((1, C2, 1), lambda b, s: (b, 0, 0)),
                pl.BlockSpec((C2, 1), lambda b, s: (0, 0)),
            ],
            out_specs=out_spec,
        ),
        compiler_params=pltpu.CompilerParams(
            dimension_semantics=("parallel", "parallel"),
            vmem_limit_bytes=_VMEM_LIMIT),
    )(x3, w_fold, shift2, alpha2)


# ---------------------------------------------------------------------------
# Forward wrapper.
# ---------------------------------------------------------------------------
def upsample_layer_forward(x, conv_w, conv_b, sn_gamma, sn_beta,
                           sn_mean_w, sn_var_w, prelu_a, *, eps=_EPS):
    """x: (B, C, H, W).  conv_w: (2C, C) [PyTorch (out,in) with 1x1 squeezed],
    conv_b: (2C,), sn_gamma/sn_beta/prelu_a: (C,), sn_mean_w/sn_var_w: (3,).
    Returns (B, C, H, 2W)."""
    B, C, H, W = x.shape
    C2, HW = 2 * C, H * W
    assert conv_w.shape == (C2, C) and conv_b.shape == (C2,)

    itemsize = jnp.dtype(x.dtype).itemsize
    x3 = x.reshape(B, C, HW)                              # free reshape, no transpose

    # ---- Pass 1: per-conv-channel sum / sumsq of W@x (bias folded in below) ----
    t1 = _pick_spatial_tile(HW, C * (2 * itemsize + 20))
    sum_wx, sq_wx = _run_pass1(x3, conv_w, t1)

    # ---- Tiny statistics mixing + folding (pure JAX on (B, C)/(B, 2C) data) ----
    # Norm channel c aggregates conv channels c and C+c (n = 2*HW elements).
    # NOTE: E[y^2] - E[y]^2 in f32 is fine for normalization-scale statistics here.
    s_all, q_all = sum_wx[..., 0], sq_wx[..., 0]          # (B, 2C) f32
    b_all = conv_b.astype(jnp.float32)
    s0, s1 = s_all[:, :C], s_all[:, C:]
    q0, q1 = q_all[:, :C], q_all[:, C:]
    b0, b1 = b_all[:C], b_all[C:]
    n = 2.0 * HW
    mean_in = (s0 + s1 + HW * (b0 + b1)) / n                                   # (B, C)
    sumsq = (q0 + 2.0 * b0 * s0 + HW * b0 * b0
             + q1 + 2.0 * b1 * s1 + HW * b1 * b1)
    var_in = (sumsq - n * mean_in * mean_in) / (n - 1.0)   # unbiased (torch.var)

    mean_ln = jnp.mean(mean_in, axis=1, keepdims=True)                         # (B, 1)
    temp = var_in + mean_in * mean_in
    var_ln = jnp.mean(temp, axis=1, keepdims=True) - mean_ln * mean_ln
    mean_bn = jnp.mean(mean_in, axis=0, keepdims=True)                         # (1, C)
    var_bn = jnp.mean(temp, axis=0, keepdims=True) - mean_bn * mean_bn

    mw = jax.nn.softmax(sn_mean_w.astype(jnp.float32))
    vw = jax.nn.softmax(sn_var_w.astype(jnp.float32))
    mean = mw[0] * mean_in + mw[1] * mean_ln + mw[2] * mean_bn                 # (B, C)
    var = vw[0] * var_in + vw[1] * var_ln + vw[2] * var_bn

    scale_c = sn_gamma.astype(jnp.float32)[None, :] * jax.lax.rsqrt(var + eps)

    # Expand per-norm-channel (C) quantities to per-conv-channel (2C = r*C + c).
    scale2 = jnp.concatenate([scale_c, scale_c], axis=1)                       # (B, 2C)
    mean2 = jnp.concatenate([mean, mean], axis=1)
    beta2 = jnp.concatenate([sn_beta, sn_beta]).astype(jnp.float32)
    shift2 = ((b_all[None, :] - mean2) * scale2 + beta2[None, :]).reshape(B, C2, 1)
    alpha2 = jnp.concatenate([prelu_a, prelu_a]).astype(jnp.float32).reshape(C2, 1)
    # Fold the norm scale into a per-batch conv weight: v = (scale*W) @ x + shift.
    w_fold = (scale2[:, :, None] * conv_w[None].astype(jnp.float32)).astype(x.dtype)

    # ---- Pass 2: normalize + PReLU (+ fused r=2 interleave), lane-dense stores ----
    t2 = _pick_spatial_tile(HW, C * (2 * itemsize + 4 * itemsize + 32))
    try:
        out = _run_pass2(x3, w_fold, shift2, alpha2, x.dtype, t2, fuse=True)
        return out.reshape(B, C, H, 2 * W)        # free reshape; already interleaved
    except Exception:
        # TODO(synk): drop this fallback once the on-chip (C,T,2)->(C,2T) lane
        # interleave is confirmed to lower on all deployed Mosaic versions.
        out_pre = _run_pass2(x3, w_fold, shift2, alpha2, x.dtype, t2, fuse=False)
        out = out_pre.reshape(B, 2, C, H, W)
        return jnp.transpose(out, (0, 2, 3, 4, 1)).reshape(B, C, H, 2 * W)


# ---------------------------------------------------------------------------
# Pure-JAX reference matching the PyTorch forward (train-mode SwitchNorm).
# ---------------------------------------------------------------------------
def upsample_layer_reference(x, conv_w, conv_b, sn_gamma, sn_beta,
                             sn_mean_w, sn_var_w, prelu_a, eps=_EPS):
    B, C, H, W = x.shape
    # SPConvTranspose2d(k=1, r=2)
    y = jnp.einsum('oc,bchw->bohw', conv_w, x) + conv_b[None, :, None, None]
    z = y.reshape(B, 2, C, H, W).transpose(0, 2, 3, 4, 1).reshape(B, C, H, 2 * W)
    # SwitchNorm2d (using_bn=True, training-mode batch stats)
    N_, C_, H_, W_ = z.shape
    zf = z.reshape(N_, C_, -1)
    mean_in = zf.mean(-1, keepdims=True)
    var_in = jnp.var(zf, axis=-1, keepdims=True, ddof=1)    # torch.var unbiased
    mean_ln = mean_in.mean(1, keepdims=True)
    temp = var_in + mean_in ** 2
    var_ln = temp.mean(1, keepdims=True) - mean_ln ** 2
    mean_bn = mean_in.mean(0, keepdims=True)
    var_bn = temp.mean(0, keepdims=True) - mean_bn ** 2
    mw = jax.nn.softmax(sn_mean_w)
    vw = jax.nn.softmax(sn_var_w)
    mean = mw[0] * mean_in + mw[1] * mean_ln + mw[2] * mean_bn
    var = vw[0] * var_in + vw[1] * var_ln + vw[2] * var_bn
    zh = (zf - mean) / jnp.sqrt(var + eps)
    zh = zh.reshape(N_, C_, H_, W_)
    out = zh * sn_gamma[None, :, None, None] + sn_beta[None, :, None, None]
    a = prelu_a[None, :, None, None]
    return jnp.where(out > 0, out, a * out)


if __name__ == "__main__":
    B, C, H, W = 2, 4, 16, 16
    key = jax.random.PRNGKey(0)
    ks = jax.random.split(key, 8)

    x = jax.random.normal(ks[0], (B, C, H, W), dtype=jnp.float32)

    # Conv2d(C -> 2C, k=1) kaiming-uniform-like init, (out, in) layout.
    bound = 1.0 / (C ** 0.5)
    conv_w = jax.random.uniform(ks[1], (2 * C, C), jnp.float32, -bound, bound)
    conv_b = jax.random.uniform(ks[2], (2 * C,), jnp.float32, -bound, bound)

    # SwitchNorm2d / PReLU parameters (randomized to exercise all terms).
    sn_gamma = 1.0 + 0.1 * jax.random.normal(ks[3], (C,), jnp.float32)
    sn_beta = 0.1 * jax.random.normal(ks[4], (C,), jnp.float32)
    sn_mean_w = 1.0 + 0.1 * jax.random.normal(ks[5], (3,), jnp.float32)
    sn_var_w = 1.0 + 0.1 * jax.random.normal(ks[6], (3,), jnp.float32)
    prelu_a = 0.25 + 0.05 * jax.random.normal(ks[7], (C,), jnp.float32)

    out = upsample_layer_forward(x, conv_w, conv_b, sn_gamma, sn_beta,
                                 sn_mean_w, sn_var_w, prelu_a)
    out = jax.block_until_ready(out)

    ref = upsample_layer_reference(x, conv_w, conv_b, sn_gamma, sn_beta,
                                   sn_mean_w, sn_var_w, prelu_a)
    assert out.shape == (B, C, H, 2 * W), out.shape
    max_err = float(jnp.max(jnp.abs(out - ref)))
    assert jnp.allclose(out, ref, atol=1e-4, rtol=1e-4), f"mismatch, max|err|={max_err}"

    print("KERNEL_OK")
</pallas_src>

<mosaic_0001>
module attributes {stable_mosaic.version = 11 : i64} {
  func.func @kernel(%arg0: i32, %arg1: i32, %arg2: memref<1x4x256xf32, #tpu.memory_space<vmem>>, %arg3: memref<8x4xf32, #tpu.memory_space<vmem>>, %arg4: memref<1x8x1xf32, #tpu.memory_space<vmem>>, %arg5: memref<1x8x1xf32, #tpu.memory_space<vmem>>) attributes {dimension_semantics = [#tpu.dimension_semantics<parallel>, #tpu.dimension_semantics<arbitrary>], iteration_bounds = array<i64: 2, 1>, scalar_prefetch = 0 : i64, scratch_operands = 0 : i64, tpu.core_type = #tpu.core_type<tc>, window_params = [{transform_indices = @transform_0, window_bounds = array<i64: 1, 4, 256>}, {pipeline_mode = #tpu.pipeline_mode<synchronous>, transform_indices = @transform_1, window_bounds = array<i64: 8, 4>}, {transform_indices = @transform_2, window_bounds = array<i64: 1, 8, 1>}, {transform_indices = @transform_3, window_bounds = array<i64: 1, 8, 1>}]} {
    %c0_i32 = arith.constant 0 : i32
    %0 = arith.cmpi eq, %arg1, %c0_i32 : i32
    %1 = arith.extui %0 : i1 to i32
    %c0_i32_0 = arith.constant 0 : i32
    %2 = arith.cmpi ne, %1, %c0_i32_0 : i32
    scf.if %2 {
      %cst_19 = arith.constant 0.000000e+00 : f32
      %24 = vector.broadcast %cst_19 : f32 to vector<1x8x1xf32>
      %c0_20 = arith.constant 0 : index
      %c0_21 = arith.constant 0 : index
      %c0_22 = arith.constant 0 : index
      %25 = vector.load %arg4[%c0_20, %c0_21, %c0_22] : memref<1x8x1xf32, #tpu.memory_space<vmem>>, vector<1x8x1xf32>
      tpu.vector_store %arg4[%c0_20, %c0_21, %c0_22], %24 {strides = array<i32>} : memref<1x8x1xf32, #tpu.memory_space<vmem>>, vector<1x8x1xf32>,
      %cst_23 = arith.constant 0.000000e+00 : f32
      %26 = vector.broadcast %cst_23 : f32 to vector<1x8x1xf32>
      %c0_24 = arith.constant 0 : index
      %c0_25 = arith.constant 0 : index
      %c0_26 = arith.constant 0 : index
      %27 = vector.load %arg5[%c0_24, %c0_25, %c0_26] : memref<1x8x1xf32, #tpu.memory_space<vmem>>, vector<1x8x1xf32>
      tpu.vector_store %arg5[%c0_24, %c0_25, %c0_26], %26 {strides = array<i32>} : memref<1x8x1xf32, #tpu.memory_space<vmem>>, vector<1x8x1xf32>,
    } else {
    }
    %c0 = arith.constant 0 : index
    %c0_1 = arith.constant 0 : index
    %3 = vector.load %arg3[%c0, %c0_1] : memref<8x4xf32, #tpu.memory_space<vmem>>, vector<8x4xf32>
    %c0_2 = arith.constant 0 : index
    %c0_3 = arith.constant 0 : index
    %c0_4 = arith.constant 0 : index
    %4 = vector.load %arg2[%c0_2, %c0_3, %c0_4] : memref<1x4x256xf32, #tpu.memory_space<vmem>>, vector<1x4x256xf32>
    %5 = vector.shape_cast %4 : vector<1x4x256xf32> to vector<4x256xf32>
    %cst = arith.constant dense<0.000000e+00> : vector<8x256xf32>
    %6 = tpu.matmul %3, %5, %cst {dimension_numbers = #tpu.dot_dimension_numbers<[1], [0], [0], [1], [0, 0, 1, 1], [], []>} : vector<8x4xf32>, vector<4x256xf32>, vector<8x256xf32> -> vector<8x256xf32>
    %c0_5 = arith.constant 0 : index
    %c0_6 = arith.constant 0 : index
    %c0_7 = arith.constant 0 : index
    %7 = vector.load %arg4[%c0_5, %c0_6, %c0_7] : memref<1x8x1xf32, #tpu.memory_space<vmem>>, vector<1x8x1xf32>
    %8 = vector.shape_cast %7 : vector<1x8x1xf32> to vector<8x1xf32>
    %cst_8 = arith.constant dense<0.000000e+00> : vector<8xf32>
    %9 = vector.multi_reduction <add>, %6, %cst_8 [1] : vector<8x256xf32> to vector<8xf32>
    %10 = vector.shape_cast %9 : vector<8xf32> to vector<8x1xf32>
    %11 = arith.addf %8, %10 : vector<8x1xf32>
    %c0_9 = arith.constant 0 : index
    %c0_10 = arith.constant 0 : index
    %c0_11 = arith.constant 0 : index
    %12 = vector.load %arg4[%c0_9, %c0_10, %c0_11] : memref<1x8x1xf32, #tpu.memory_space<vmem>>, vector<1x8x1xf32>
    %13 = vector.shape_cast %12 : vector<1x8x1xf32> to vector<8x1xf32>
    %14 = vector.shape_cast %11 : vector<8x1xf32> to vector<1x8x1xf32>
    tpu.vector_store %arg4[%c0_9, %c0_10, %c0_11], %14 {strides = array<i32>} : memref<1x8x1xf32, #tpu.memory_space<vmem>>, vector<1x8x1xf32>,
    %c0_12 = arith.constant 0 : index
    %c0_13 = arith.constant 0 : index
    %c0_14 = arith.constant 0 : index
    %15 = vector.load %arg5[%c0_12, %c0_13, %c0_14] : memref<1x8x1xf32, #tpu.memory_space<vmem>>, vector<1x8x1xf32>
    %16 = vector.shape_cast %15 : vector<1x8x1xf32> to vector<8x1xf32>
    %17 = arith.mulf %6, %6 : vector<8x256xf32>
    %cst_15 = arith.constant dense<0.000000e+00> : vector<8xf32>
    %18 = vector.multi_reduction <add>, %17, %cst_15 [1] : vector<8x256xf32> to vector<8xf32>
    %19 = vector.shape_cast %18 : vector<8xf32> to vector<8x1xf32>
    %20 = arith.addf %16, %19 : vector<8x1xf32>
    %c0_16 = arith.constant 0 : index
    %c0_17 = arith.constant 0 : index
    %c0_18 = arith.constant 0 : index
    %21 = vector.load %arg5[%c0_16, %c0_17, %c0_18] : memref<1x8x1xf32, #tpu.memory_space<vmem>>, vector<1x8x1xf32>
    %22 = vector.shape_cast %21 : vector<1x8x1xf32> to vector<8x1xf32>
    %23 = vector.shape_cast %20 : vector<8x1xf32> to vector<1x8x1xf32>
    tpu.vector_store %arg5[%c0_16, %c0_17, %c0_18], %23 {strides = array<i32>} : memref<1x8x1xf32, #tpu.memory_space<vmem>>, vector<1x8x1xf32>,
    return
  }
  func.func @transform_0(%arg0: i32, %arg1: i32) -> (i32, i32, i32) {
    %c0_i32 = arith.constant 0 : i32
    %c0_i32_0 = arith.constant 0 : i32
    return %arg0, %c0_i32, %arg1 : i32, i32, i32
  }
  func.func @transform_1(%arg0: i32, %arg1: i32) -> (i32, i32) {
    %c0_i32 = arith.constant 0 : i32
    %c0_i32_0 = arith.constant 0 : i32
    %c0_i32_1 = arith.constant 0 : i32
    return %c0_i32, %c0_i32_0 : i32, i32
  }
  func.func @transform_2(%arg0: i32, %arg1: i32) -> (i32, i32, i32) {
    %c0_i32 = arith.constant 0 : i32
    %c0_i32_0 = arith.constant 0 : i32
    %c0_i32_1 = arith.constant 0 : i32
    return %arg0, %c0_i32, %c0_i32_0 : i32, i32, i32
  }
  func.func @transform_3(%arg0: i32, %arg1: i32) -> (i32, i32, i32) {
    %c0_i32 = arith.constant 0 : i32
    %c0_i32_0 = arith.constant 0 : i32
    %c0_i32_1 = arith.constant 0 : i32
    return %arg0, %c0_i32, %c0_i32_0 : i32, i32, i32
  }
}

</mosaic_0001>

<bundles_post_ra>
// kernel: tpu_custom_call.1
= control target key start
LH: loop header
LB: loop body
LE: loop exit
PB: predicated region body
PF: predicated region fallthrough
CT: control target
= control target key end

     0   :  { %9 = vsyncpa [#allocation3], 0  ;;  %s676_s0 = inlined_call_operand.hbm [shape: f32[2,4,256], index: 0, kind: input, shape index: {}]   ;;  %s677_s1 = inlined_call_operand.vmem [shape: f32[8,4], index: 1, kind: input, shape index: {}]   ;;  %s678_s2 = inlined_call_operand.vmem [shape: f32[2,8,1], index: 2, kind: output, shape index: {0}]   ;;  %s679_s3 = inlined_call_operand.vmem [shape: f32[2,8,1], index: 3, kind: output, shape index: {1}]  }
   0x1   :  { %11 = vsyncpa [#allocation3 + $0x1], 0  ;;  %s578_s12 = smov 0   ;;  %s580_s13 = smov 0  }
   0x2   :  { %s582_s14 = smov 0   ;;  %s584_s15 = smov 0  }
   0x3   :  { %s586_s16 = smov 0   ;;  %s588_s17 = smov 0  }
   0x4 LB: > { %s401_s18 = sadd.s32 4294967295, %s555_s17   ;;  %s29_s19 = sadd.s32 1, %s551_s16  ;;  %s555_s17 = sphi %s588_s17, %s17_s17   ;;  %s551_s16 = sphi %s586_s16, %s686_s16   ;;  %s547_s15 = sphi %s584_s15, %s685_s15   ;;  %s543_s14 = sphi %s582_s14, %s684_s14   ;;  %s539_s13 = sphi %s580_s13, %s683_s13   ;;  %s535_s12 = sphi %s578_s12, %s682_s12  }
   0x5   : > { %p31_p0 = scmp.ge.s32.totalorder %s29_s19, 2  ;;  %s38_s20 = sadd.s32 1, %s543_s14 }
   0x6   : > { %p45_p1 = scmp.ne.s32.totalorder %s543_s14, %s539_s13  ;;  %p46_p2 = scmp.eq.s32.totalorder %s555_s17, 0 }
   0x7   : > { %s688_s19 = smov (%p31_p0, %s29_s19), 0  ;;  %p51_p4 = scmp.ne.s32.totalorder %s539_s13, %s535_s12 }
   0x8   : > { %p614_p3 = por %p46_p2, %p45_p1  ;;  %s33_s22 = ssub.s32 %s551_s16, %s688_s19 }
   0x9   : > { %p52_p5 = scmp.eq.s32.totalorder %s401_s18, 0  ;;  %p36_p6 = scmp.eq.s32.totalorder %s33_s22, 0 }
   0xa   : > { %p425_p8 = scmp.lt.s32.totalorder %s555_s17, 2  ;;  %s151_s25 = sand.u32 1, %s543_s14  }
   0xb   : > { %p621_p7 = por %p52_p5, %p51_p4  ;;  %s418_s26 = sshll.u32 %s551_s16, 3 }
   0xc   : > { %s627_s24 = scalar_select %p36_p6, %s543_s14, %s38_s20  }
   0xd   : > { %s405_s27 = sshll.u32 %s151_s25, 3  ;;  %s162_s30 = scalar_lea.hbm %s676_s0, %s418_s26 }
   0xe   : > { %s164_s4 = sshll.u32 %s162_s30, 4  ;;  %s155_s5 = scalar_lea.vmem [#allocation2], %s405_s27  ;;  %s165_s4 = int_to_ptr.hbm [resolvable:$true] %s164_s4 }
   0xf   : > { %s166_s6 = sshll.u32 %s155_s5, 4  ;;  %p422_p9 = pnand %p425_p8, %p614_p3  ;;  %s167_s6 = int_to_ptr.vmem [resolvable:$true] %s166_s6 }
  0x10   : > { %p408_p10 = scmp.ge.s32.totalorder %s555_s17, 1  ;;  %p171_p11 = scmp.lt.s32.totalorder %s555_s17, 3 }
  0x11   : > { %s152_s7 = scalar_lea.sflag [#allocation3], %s151_s25 }
  0x12   : > { %424 = dma.hbm_to_vmem [thread:$0]  (!%p422_p9), %s165_s4, 128, %s167_s6, %s152_s7  }
  0x13   : > { %p172_p12 = pnand %p408_p10, %p171_p11 }
  0x14   : > { %s177_s8 = sand.u32 (!%p172_p12), 1, %s539_s13  }
  0x15   : > { %175 = sbr.rel (%p172_p12) target bundleno = 292 (0x124), region = 28  ;;  %s409_s9 = sshll.u32 (!%p172_p12), %s177_s8, 3 }
  0x16   : > { %s178_s10 = scalar_lea.sflag (!%p172_p12), [#allocation3], %s177_s8  ;;  %s181_s11 = scalar_lea.vmem (!%p172_p12), [#allocation2], %s409_s9 }
  0x1a   : > { %530 = dma.done.wait (%p621_p7), %s178_s10, 128  }
  0x1b   : > { %532 = vsyncadd (%p621_p7), %s178_s10, 4294967168  ;;  %v225_v0 = vld [vmem:[%s181_s11] sm:$0xff]  ;;  %vm234_vm0 = vcmask 1043456   ;;  %v224_v1 = vld [vmem:[%s677_s1] sm:$0xff]  ;;  %vm230_vm1 = vcmask 31744   ;;  %p209_p13 = scmp.lt.s32.totalorder %s547_s15, 1 }
  0x1c   : > { %227 = vst [vmem:[#allocation1] ss:$2 sm:$0xff] %v225_v0  ;;  %vm221_vm2 = vcmask 7168   ;;  %v557_v4 = vmov 0.0  }
  0x1d   : > { %s690_s15 = smov (!%p209_p13, %s547_s15), 1 }
  0x1e   : > { %s410_s20 = sshll.u32 %s690_s15, 3 }
  0x1f   : > { %s212_s23 = scalar_lea.vmem %s678_s2, %s410_s20  ;;  %s216_s27 = scalar_lea.vmem %s679_s3, %s410_s20 }
  0x20   : > { %222 = vst.msk [vmem:[%s212_s23] sm:$0xff] %vm221_vm2, %v557_v4 }
  0x21   : > { %223 = vst.msk [vmem:[%s216_s27] sm:$0xff] %vm221_vm2, %v557_v4 }
  0x23   : > { %v228_v2 = vld.sshfl [vmem:[#allocation1] sm:$0xff pattern:$0x75316420]  ;;  %v229_v3 = vld.sshfl [vmem:[#allocation1 + $0x8] sm:$0xff pattern:$0x75316420] }
  0x24   : > { %412 = vmatpush.msk.msra.mxu0 %vm234_vm0, %v228_v2  ;;  %414 = vmatpush.msk.msra.mxu1 %vm234_vm0, %v229_v3 }
  0x25   : > { %413 = vmatmul.msk.f32.vlgmr.msra.gmra.mxu0 %vm230_vm1, %v224_v1  ;;  %415 = vmatmul.msk.f32.vlgmr.msra.gmra.mxu1 %vm230_vm1, %v224_v1 }
  0x27   : > { %v279_v11 = vld [vmem:[%s212_s23] sm:$0xff] }
  0x28   : > { %v286_v14 = vld [vmem:[%s216_s27] sm:$0xff] }
  0xa2   : > { %v256_v5 = vpop.f32.mrf.mxu0  ;;  %v276_v6 = vpop.f32.mrf.mxu1 }
  0xa3   : > { %v280_v7 = vadd.f32 %v276_v6, %v256_v5  ;;  %v287_v8 = vmul.f32 %v256_v5, %v256_v5  ;;  %v288_v9 = vmul.f32 %v276_v6, %v276_v6 }
  0xa5   : > { %281 = vadd.xlane.f32.xlu0 %v280_v7  ;;  %v289_v10 = vadd.f32 %v288_v9, %v287_v8 }
  0xad   : > { %290 = vadd.xlane.f32.xlu0 %v289_v10 }
 0x118   : > { %v282_v12 = vpop.xlane.xlu0 %281 }
 0x119   : > { %v283_v13 = vadd.f32 %v282_v12, %v279_v11 }
 0x11b   : > { %285 = vst.msk [vmem:[%s212_s23] sm:$0xff] %vm221_vm2, %v283_v13 }
 0x120   : > { %v291_v15 = vpop.xlane.xlu0 %290 }
 0x121   : > { %v292_v16 = vadd.f32 %v291_v15, %v286_v14 }
 0x123   : > { %293 = vst.msk [vmem:[%s216_s27] sm:$0xff] %vm221_vm2, %v292_v16 }
 0x124 PF: > { %s17_s17 = sadd.s32 1, %s555_s17   ;;  %s682_s12 = smov %s539_s13 }
 0x125   : > { %p14_p0 = scmp.ge.s32.totalorder %s17_s17, 4   ;;  %s683_s13 = smov %s543_s14 }
 0x126   : > { %s684_s14 = smov %s627_s24  ;;  %s685_s15 = smov %s551_s16 }
 0x127   : > { %s686_s16 = smov %s688_s19  ;;  %16 = sbr.rel (!%p14_p0) target bundleno = 4 (0x4), region = 84 }
 0x12c   :  { %327 = vsyncpa [#allocation3], 1 }
 0x12d   :  { %329 = vsyncpa [#allocation3 + $0x1], 1 }

</bundles_post_ra>
